<compile_context>
chip_gen: v7x
topology: tpu7x:2x2x1
jax: 0.10.0
libtpu: 0.0.40
codegen_flags: <defaults>
</compile_context>

<pallas_src>
import functools

import jax
import jax.numpy as jnp
from jax import lax
from jax.experimental import pallas as pl
from jax.experimental.pallas import tpu as pltpu


# ---- packed-parameter slab layout (kernel and pack_params must match) -------
_P_ROWS, _P_COLS = 64, 128     # one (8,128)-aligned f32 slab, 32 KiB
_W1_R = 0      # fc1.weight (20,10) at rows  0:20, lanes 0:10
_B1_R = 24     # fc1.bias   (20,)   at rows 24:44, lane  0
_W2_R = 48     # fc2.weight (5,20)  at rows 48:53, lanes 0:20
_B2_R = 56     # fc2.bias   (5,)    at rows 56:61, lane  0


def npc_decision_kernel(x_ref, p_ref, oT_ref):
    x = x_ref[...]                                   # (TB, 10), natural layout

    w1 = p_ref[_W1_R:_W1_R + 20, 0:10]               # (20, 10)
    b1 = p_ref[_B1_R:_B1_R + 20, 0:1]                # (20, 1)
    w2 = p_ref[_W2_R:_W2_R + 5, 0:20]                # (5, 20)
    b2 = p_ref[_B2_R:_B2_R + 5, 0:1]                 # (5, 1)

    # fc1 + ReLU.  Contract the 10-feature axis of BOTH operands so the MXU
    # consumes x in its natural layout and the result lands lane-dense:
    #   (20, 10) . (TB, 10)^T -> (20, TB)   (batch on lanes from here on).
    hT = lax.dot_general(w1, x, (((1,), (1,)), ((), ())),
                         preferred_element_type=jnp.float32) + b1
    hT = jnp.maximum(hT, 0.0)

    # fc2 -> (5, TB)
    logitsT = jnp.dot(w2, hT, preferred_element_type=jnp.float32) + b2

    # Numerically stable softmax over the 5 classes (sublane axis).
    # Exact divide (NOT pl.reciprocal(approx=True)) so rows sum to 1 exactly
    # up to f32 round-off.
    m = jnp.max(logitsT, axis=0, keepdims=True)      # (1, TB)
    e = jnp.exp(logitsT - m)
    oT_ref[...] = e / jnp.sum(e, axis=0, keepdims=True)


def pack_params(w1, b1, w2, b2):
    """Pack PyTorch-layout params (w1:(20,10), b1:(20,), w2:(5,20), b2:(5,))
    into one (64,128) f32 slab.  Every tensor starts on an (8,128) sub-tile
    boundary; biases sit at lane 0 of their own row block."""
    P = jnp.zeros((_P_ROWS, _P_COLS), jnp.float32)
    P = P.at[_W1_R:_W1_R + 20, 0:10].set(w1.astype(jnp.float32))
    P = P.at[_B1_R:_B1_R + 20, 0].set(b1.astype(jnp.float32))
    P = P.at[_W2_R:_W2_R + 5, 0:20].set(w2.astype(jnp.float32))
    P = P.at[_B2_R:_B2_R + 5, 0].set(b2.astype(jnp.float32))
    return P


def _round_up(x, m):
    return ((x + m - 1) // m) * m


def _pick_tile(B, block_b):
    """Batch tile: multiple of 128 (or B itself for tiny batches), capped at
    block_b, and chosen so the grid has >=2 steps whenever B > 128 so both
    v7x TensorCores get work."""
    if B <= 128:
        return B
    return min(_round_up(block_b, 128), _round_up(pl.cdiv(B, 2), 128))


def _vmem_limit_bytes(TB):
    # Double-buffered blocks, padded to the (8,128) VMEM tile:
    in_buf = _round_up(TB, 8) * 128 * 4       # (TB,10): lanes pad 10 -> 128
    out_buf = 8 * _round_up(TB, 128) * 4      # (5,TB): sublanes pad 5 -> 8
    par_buf = _P_ROWS * _P_COLS * 4
    need = 2 * (in_buf + out_buf + par_buf)
    # Headroom, but stay within v7x's 64 MiB physical VMEM per TensorCore.
    return int(min(max(need + (8 << 20), 16 << 20), 64 << 20))


@functools.partial(jax.jit, static_argnames=("block_b",))
def npc_decision_forward_t(x, params_packed, *, block_b=32768):
    """x: (B, 10).  Returns the class-major probabilities (5, B) — the
    lane-dense layout the kernel writes, with no extra HBM transpose pass.
    Prefer this entry point if the consumer can take (5, B)."""
    B = x.shape[0]
    x = x.astype(jnp.float32)
    TB = _pick_tile(B, block_b)
    grid = (pl.cdiv(B, TB),)

    return pl.pallas_call(
        npc_decision_kernel,
        out_shape=jax.ShapeDtypeStruct((5, B), jnp.float32),
        grid_spec=pltpu.PrefetchScalarGridSpec(
            num_scalar_prefetch=0,
            grid=grid,
            in_specs=[
                pl.BlockSpec((TB, 10), lambda i: (i, 0)),            # x, natural layout
                pl.BlockSpec((_P_ROWS, _P_COLS), lambda i: (0, 0)),  # params, resident
            ],
            out_specs=pl.BlockSpec((5, TB), lambda i: (0, i)),       # lane-dense store
        ),
        compiler_params=pltpu.CompilerParams(
            dimension_semantics=("parallel",),      # megacore batch sharding
            vmem_limit_bytes=_vmem_limit_bytes(TB),
        ),
    )(x, params_packed)


@functools.partial(jax.jit, static_argnames=("block_b",))
def npc_decision_forward(x, params_packed, *, block_b=32768):
    """Drop-in PyTorch semantics: x (B, 10) -> softmax probabilities (B, 5)."""
    return npc_decision_forward_t(x, params_packed, block_b=block_b).T


def init_params(key):
    """Deterministic init mimicking nn.Linear's U(-1/sqrt(fan_in), 1/sqrt(fan_in)),
    in PyTorch (out_features, in_features) layout."""
    k1, k2, k3, k4 = jax.random.split(key, 4)
    bound1 = 1.0 / jnp.sqrt(10.0)
    bound2 = 1.0 / jnp.sqrt(20.0)
    w1 = jax.random.uniform(k1, (20, 10), jnp.float32, -bound1, bound1)
    b1 = jax.random.uniform(k2, (20,), jnp.float32, -bound1, bound1)
    w2 = jax.random.uniform(k3, (5, 20), jnp.float32, -bound2, bound2)
    b2 = jax.random.uniform(k4, (5,), jnp.float32, -bound2, bound2)
    return w1, b1, w2, b2


def _reference(x, w1, b1, w2, b2):
    h = jnp.maximum(x @ w1.T + b1, 0.0)
    return jax.nn.softmax(h @ w2.T + b2, axis=1)


if __name__ == "__main__":
    key = jax.random.PRNGKey(0)
    kp, kx1, kx2, kx3 = jax.random.split(key, 4)

    w1, b1, w2, b2 = init_params(kp)
    params_packed = pack_params(w1, b1, w2, b2)

    def check(x, **kw):
        out = jax.block_until_ready(npc_decision_forward(x, params_packed, **kw))
        ref = _reference(x, w1, b1, w2, b2)
        assert out.shape == (x.shape[0], 5)
        # Elementwise vs. reference (loose: MXU vs XLA f32 matmul precision).
        assert jnp.allclose(out, ref, atol=2e-3, rtol=2e-3)
        # Exact normalization (tight: kernel divides exactly).
        assert jnp.allclose(jnp.sum(out, axis=1), 1.0, atol=1e-5)
        return out

    # 1) Small batch: single full-extent block, grid of 1.
    x1 = jax.random.normal(kx1, (8, 10), jnp.float32)
    check(x1)

    # 2) Multi-block grid with an uneven trailing block (384 -> TB=256, grid=2):
    #    exercises Pallas' edge masking (no host-side padding).
    x2 = jax.random.normal(kx2, (384, 10), jnp.float32)
    check(x2)

    # 3) Explicit small tile to exercise a deeper pipelined grid (640/128 = 5 steps).
    x3 = jax.random.normal(kx3, (640, 10), jnp.float32)
    check(x3, block_b=128)

    # Transposed-output entry point (no final HBM transpose) is consistent.
    outT = jax.block_until_ready(npc_decision_forward_t(x1, params_packed))
    assert outT.shape == (5, 8)
    assert jnp.allclose(outT.T, npc_decision_forward(x1, params_packed), atol=1e-6)

    print("KERNEL_OK")
</pallas_src>

<mosaic_0001>
module attributes {stable_mosaic.version = 11 : i64} {
  func.func @npc_decision_kernel(%arg0: i32, %arg1: memref<8x10xf32, #tpu.memory_space<vmem>>, %arg2: memref<64x128xf32, #tpu.memory_space<vmem>>, %arg3: memref<5x8xf32, #tpu.memory_space<vmem>>) attributes {dimension_semantics = [#tpu.dimension_semantics<parallel>], iteration_bounds = array<i64: 1>, scalar_prefetch = 0 : i64, scratch_operands = 0 : i64, tpu.core_type = #tpu.core_type<tc>, window_params = [{transform_indices = @transform_0, window_bounds = array<i64: 8, 10>}, {pipeline_mode = #tpu.pipeline_mode<synchronous>, transform_indices = @transform_1, window_bounds = array<i64: 64, 128>}, {transform_indices = @transform_2, window_bounds = array<i64: 5, 8>}]} {
    %c0 = arith.constant 0 : index
    %c0_0 = arith.constant 0 : index
    %0 = vector.load %arg1[%c0, %c0_0] : memref<8x10xf32, #tpu.memory_space<vmem>>, vector<8x10xf32>
    %c0_1 = arith.constant 0 : index
    %c0_2 = arith.constant 0 : index
    %1 = vector.load %arg2[%c0_1, %c0_2] : memref<64x128xf32, #tpu.memory_space<vmem>>, vector<20x10xf32>
    %c24 = arith.constant 24 : index
    %c0_3 = arith.constant 0 : index
    %2 = vector.load %arg2[%c24, %c0_3] : memref<64x128xf32, #tpu.memory_space<vmem>>, vector<20x1xf32>
    %c48 = arith.constant 48 : index
    %c0_4 = arith.constant 0 : index
    %3 = vector.load %arg2[%c48, %c0_4] : memref<64x128xf32, #tpu.memory_space<vmem>>, vector<5x20xf32>
    %c56 = arith.constant 56 : index
    %c0_5 = arith.constant 0 : index
    %4 = vector.load %arg2[%c56, %c0_5] : memref<64x128xf32, #tpu.memory_space<vmem>>, vector<5x1xf32>
    %cst = arith.constant dense<0.000000e+00> : vector<20x8xf32>
    %5 = tpu.matmul %1, %0, %cst {dimension_numbers = #tpu.dot_dimension_numbers<[1], [1], [0], [0], [0, 0, 1, 0], [], []>} : vector<20x10xf32>, vector<8x10xf32>, vector<20x8xf32> -> vector<20x8xf32>
    %6 = vector.broadcast %2 : vector<20x1xf32> to vector<20x8xf32>
    %7 = arith.addf %5, %6 : vector<20x8xf32>
    %cst_6 = arith.constant 0.000000e+00 : f32
    %8 = vector.broadcast %cst_6 : f32 to vector<20x8xf32>
    %9 = arith.maximumf %7, %8 : vector<20x8xf32>
    %cst_7 = arith.constant dense<0.000000e+00> : vector<5x8xf32>
    %10 = tpu.matmul %3, %9, %cst_7 {dimension_numbers = #tpu.dot_dimension_numbers<[1], [0], [0], [1], [0, 0, 1, 1], [], []>} : vector<5x20xf32>, vector<20x8xf32>, vector<5x8xf32> -> vector<5x8xf32>
    %11 = vector.broadcast %4 : vector<5x1xf32> to vector<5x8xf32>
    %12 = arith.addf %10, %11 : vector<5x8xf32>
    %cst_8 = arith.constant dense<0xFF800000> : vector<8xf32>
    %13 = vector.multi_reduction <maximumf>, %12, %cst_8 [0] : vector<5x8xf32> to vector<8xf32>
    %14 = vector.shape_cast %13 : vector<8xf32> to vector<1x8xf32>
    %15 = vector.broadcast %14 : vector<1x8xf32> to vector<5x8xf32>
    %16 = arith.subf %12, %15 : vector<5x8xf32>
    %17 = math.exp %16 : vector<5x8xf32>
    %cst_9 = arith.constant dense<0.000000e+00> : vector<8xf32>
    %18 = vector.multi_reduction <add>, %17, %cst_9 [0] : vector<5x8xf32> to vector<8xf32>
    %19 = vector.shape_cast %18 : vector<8xf32> to vector<1x8xf32>
    %20 = vector.broadcast %19 : vector<1x8xf32> to vector<5x8xf32>
    %21 = arith.divf %17, %20 : vector<5x8xf32>
    %c0_10 = arith.constant 0 : index
    %c0_11 = arith.constant 0 : index
    %22 = vector.load %arg3[%c0_10, %c0_11] : memref<5x8xf32, #tpu.memory_space<vmem>>, vector<5x8xf32>
    tpu.vector_store %arg3[%c0_10, %c0_11], %21 {strides = array<i32>} : memref<5x8xf32, #tpu.memory_space<vmem>>, vector<5x8xf32>,
    return
  }
  func.func @transform_0(%arg0: i32) -> (i32, i32) {
    %c0_i32 = arith.constant 0 : i32
    %c0_i32_0 = arith.constant 0 : i32
    return %arg0, %c0_i32 : i32, i32
  }
  func.func @transform_1(%arg0: i32) -> (i32, i32) {
    %c0_i32 = arith.constant 0 : i32
    %c0_i32_0 = arith.constant 0 : i32
    %c0_i32_1 = arith.constant 0 : i32
    return %c0_i32, %c0_i32_0 : i32, i32
  }
  func.func @transform_2(%arg0: i32) -> (i32, i32) {
    %c0_i32 = arith.constant 0 : i32
    %c0_i32_0 = arith.constant 0 : i32
    return %c0_i32, %arg0 : i32, i32
  }
}

</mosaic_0001>

<bundles_post_ra>
// kernel: npc_decision_forward_t.1
= control target key start
LH: loop header
LB: loop body
LE: loop exit
PB: predicated region body
PF: predicated region fallthrough
CT: control target
= control target key end

     0   :  { %7 = vsyncpa [#allocation3], 0  ;;  %s480_s0 = inlined_call_operand.hbm [shape: f32[8,10], index: 0, kind: input, shape index: {}]   ;;  %s481_s1 = inlined_call_operand.hbm [shape: f32[64,128], index: 1, kind: input, shape index: {}]   ;;  %s482_s2 = inlined_call_operand.hbm [shape: f32[5,8], index: 2, kind: output, shape index: {}]  }
   0x1   :  { %8 = vsyncpa [#allocation6], 0 }
   0x2   :  { %9 = vsyncpa [#allocation4], 0  ;;  %s402_s9 = smov [#allocation2]   ;;  %s403_s11 = smov [#allocation5]  }
   0x3   :  { %s16_s10 = sshll.u32 %s402_s9, 4  ;;  %s25_s12 = sshll.u32 %s403_s11, 4  ;;  %s17_s10 = int_to_ptr.vmem [resolvable:$true] %s16_s10  ;;  %s426_s12 = int_to_ptr.vmem [resolvable:$true] %s25_s12 }
   0x4   :  { %s330_s15 = scalar_lea.hbm %s480_s0, 128 }
   0x5   :  { %p331_p0 = scmp.ne.s32.totalorder %s480_s0, %s330_s15  ;;  %p334_p1 = scmp.lt.u32.totalorder %s330_s15, %s480_s0 }
   0x7   :  { %p336_p2 = pnand %p334_p1, %p331_p0 }
   0x9   :  { %339 = shalt.err (!%p336_p2)
}
   0xa   :  { %s340_s20 = scalar_lea.vmem %s17_s10, 128  ;;  %p345_p4 = scmp.lt.s32.totalorder %s17_s10, %s17_s10 }
   0xb   :  { %p341_p3 = scmp.ne.s32.totalorder %s17_s10, %s340_s20  ;;  %p346_p5 = scmp.lt.s32.totalorder %s340_s20, %s340_s20 }
   0xd   :  { %p347_p6 = por %p346_p5, %p345_p4 }
   0xf   :  { %p348_p7 = pnand %p347_p6, %p341_p3 }
  0x11   :  { %351 = shalt.err (!%p348_p7)
}
  0x12   :  { %19 = dma.hbm_to_vmem [thread:$0]  %s480_s0, 128, %s17_s10, [#allocation3]  }
  0x13   :  { %s352_s25 = scalar_lea.hbm %s481_s1, 1024 }
  0x14   :  { %p353_p8 = scmp.ne.s32.totalorder %s481_s1, %s352_s25  ;;  %p356_p9 = scmp.lt.u32.totalorder %s352_s25, %s481_s1 }
  0x16   :  { %p358_p10 = pnand %p356_p9, %p353_p8 }
  0x18   :  { %361 = shalt.err (!%p358_p10)
}
  0x19   :  { %s362_s30 = scalar_lea.vmem %s426_s12, 1024  ;;  %p367_p12 = scmp.lt.s32.totalorder %s426_s12, %s426_s12 }
  0x1a   :  { %p363_p11 = scmp.ne.s32.totalorder %s426_s12, %s362_s30  ;;  %p368_p13 = scmp.lt.s32.totalorder %s362_s30, %s362_s30 }
  0x1c   :  { %p369_p0 = por %p368_p13, %p367_p12 }
  0x1e   :  { %p370_p1 = pnand %p369_p0, %p363_p11 }
  0x20   :  { %373 = shalt.err (!%p370_p1)
}
  0x21   :  { %s404_s0 = smov 128   ;;  %s405_s3 = smov 8  }
  0x22   :  { %31 = dma.hbm_to_vmem [thread:$0]  %s481_s1, 1024, %s426_s12, [#allocation6], %s404_s0, %s404_s0, %s405_s3  }
  0x23   :  { %396 = dma.done.wait [#allocation3], 128  }
  0x24   :  { %397 = vsyncadd [#allocation3], 4294967168 }
  0x25   :  { %398 = dma.done.wait [#allocation6], 1024  }
  0x26   :  { %399 = vsyncadd [#allocation6], 4294966272  ;;  %v406_v0 = vmov 0.0   ;;  %vm407_vm0 = vmmov 0   ;;  %v408_v1 = vmov 0   ;;  %vm62_vm1 = vcmask 80896  }
  0x27   :  { %292 = vmatprep.subr.mxu0 %v406_v0  ;;  %294 = vmatprep.mubr.msk.f32.mxu0 %vm407_vm0, %v406_v0  ;;  %v38_v2 = vld [vmem:[#allocation2] sm:$0xff]  ;;  %v39_v3 = vld [vmem:[#allocation5] sm:$0xff]  ;;  %v44_v5 = vld [vmem:[#allocation5 + $0x28] sm:$0xf]  ;;  %v409_v10 = vmov 0.0|0.0   ;;  %vm167_vm2 = vcmask 1043456  }
  0x28   :  { %324 = vset.pattern.permute.xlu0 %v408_v1  ;;  %325 = vset.pattern.permute.xlu1 %v408_v1  ;;  %v42_v4 = vld [vmem:[#allocation5 + $0x18] sm:$0xff]  ;;  %v43_v6 = vld [vmem:[#allocation5 + $0x20] sm:$0xff]  ;;  %v40_v8 = vld [vmem:[#allocation5 + $0x8] sm:$0xff]  ;;  %vm163_vm3 = vcmask 162816   ;;  %vm241_vm4 = vcmask 61440   ;;  %s410_s1 = smov [#allocation7]  }
  0x29   :  { %309 = vmatprep.mubr.msk.f32.mxu1 %vm407_vm0, %v406_v0  ;;  %293 = vmatpush3.xpose.msk.msra.mxu0 %vm62_vm1, %v38_v2  ;;  %v46_v7 = vld [vmem:[#allocation5 + $0x38] sm:$0x1f]  ;;  %v41_v9 = vld [vmem:[#allocation5 + $0x10] sm:$0xf]  ;;  %s268_s6 = sshll.u32 %s410_s1, 4  ;;  %s269_s6 = int_to_ptr.vmem [resolvable:$true] %s268_s6 }
  0x2a   :  { %49 = vperm.xlu0 %324, %v42_v4   ;;  %59 = vperm.xlu1 %325, %v44_v5   ;;  %v45_v27 = vld [vmem:[#allocation5 + $0x30] sm:$0x1f]  ;;  %s374_s7 = scalar_lea.vmem %s269_s6, 128  ;;  %p379_p3 = scmp.lt.s32.totalorder %s269_s6, %s269_s6 }
  0x2b   :  { %312 = vmatprep.subr.bf16.mxu1 %v409_v10  ;;  %p375_p2 = scmp.ne.s32.totalorder %s269_s6, %s374_s7  ;;  %p380_p4 = scmp.lt.s32.totalorder %s374_s7, %s374_s7 }
  0x2c   :  { %295 = vmatmul.mubr.msk.f32.vlgmr.msra.gmra.mrb[0].mxu0 %vm62_vm1, %v39_v3 }
  0x2d   :  { %297 = vmatprep.mubr.msk.f32.mxu0 %vm407_vm0, %v406_v0  ;;  %p381_p5 = por %p380_p4, %p379_p3 }
  0x2e   :  { %54 = vperm.xlu0 %324, %v43_v6   ;;  %160 = vperm.xlu1 %325, %v46_v7  }
  0x2f   :  { %p382_p6 = pnand %p381_p5, %p375_p2 }
  0x30   :  { %298 = vmatmul.mubr.msk.f32.gmra.mrb[2].mxu0 %vm62_vm1, %v40_v8 }
  0x31   :  { %300 = vmatprep.mubr.msk.f32.mxu0 %vm407_vm0, %v406_v0 }
  0x34   :  { %301 = vmatmul.mubr.msk.f32.gmra.mrb[4].mxu0 %vm62_vm1, %v41_v9 }
  0xa9   :  { %v50_v11 = vpop.permute.xlu0 %49  ;;  %v60_v21 = vpop.permute.xlu1 %59 }
  0xad   :  { %v55_v15 = vpop.permute.xlu0 %54  ;;  %v161_v28 = vpop.permute.xlu1 %160 }
  0xff   :  { %v141_v12 = vpop.f32.mrb[0].mxu0 }
 0x100   :  { %v296_v13 = vpop.f32.mrb[1].mxu0  ;;  %v142_v14 = vadd.f32 %v141_v12, %v50_v11 }
 0x102   :  { %v155_v19 = vmax.f32 %v142_v14, 0.0 }
 0x103   :  { %v146_v16 = vpop.f32.mrb[2].mxu0 }
 0x104   :  { %v147_v17 = vadd.f32 %v146_v16, %v55_v15  ;;  %v299_v18 = vpop.f32.mrb[3].mxu0 }
 0x106   :  { %v156_v20 = vmax.f32 %v147_v17, 0.0 }
 0x107   :  { %v151_v22 = vpop.f32.mrb[4].mxu0 }
 0x108   :  { %v152_v23 = vadd.f32 %v151_v22, %v60_v21  ;;  %v302_v24 = vpop.f32.mrb[5].mxu0  ;;  %v313_v25 = vpack.c.bf16 %v156_v20, %v155_v19 }
 0x10a   :  { %v157_v26 = vmax.f32 %v152_v23, 0.0  ;;  %314 = vmatpush3.bf16.msra.mxu1 %v313_v25 }
 0x10b   :  { %307 = vmatprep.subr.mxu1 %v406_v0 }
 0x10e   :  { %308 = vmatpush3.msk.msra.mxu1 %vm167_vm2, %v157_v26 }
 0x10f   :  { %310 = vmatmul.mubr.msk.f32.vlgmr.msra.gmra.mrb[0].mxu1 %vm163_vm3, %v45_v27 }
 0x1e2   :  { %v237_v29 = vpop.f32.mrb[0].mxu1 }
 0x1e3   :  { %v238_v30 = vadd.f32 %v237_v29, %v161_v28  ;;  %v311_v31 = vpop.f32.mrb[1].mxu1 }
 0x1e5   :  { %v242_v32 = vsel %vm241_vm4, %v238_v30, -inf }
 0x1e6   :  { %v243_v33 = vrot.slane %v242_v32, 4 }
 0x1e8   :  { %v244_v34 = vmax.f32 %v242_v32, %v243_v33 }
 0x1ea   :  { %v245_v35 = vrot.slane %v244_v34, 2 }
 0x1ec   :  { %v246_v36 = vmax.f32 %v244_v34, %v245_v35 }
 0x1ee   :  { %v247_v37 = vrot.slane %v246_v36, 1 }
 0x1f0   :  { %v248_v38 = vmax.f32 %v246_v36, %v247_v37 }
 0x1f2   :  { %v249_v39 = vsub.f32 %v238_v30, %v248_v38 }
 0x1f4   :  { %v250_v40 = vmul.f32 1.442695, %v249_v39 }
 0x1f6   :  { %326 = vpow2.f32 %v250_v40 }
 0x200   :  { %v327_v41 = vpop.eup %326 }
 0x201   :  { %v252_v42 = vsel %vm241_vm4, %v327_v41, 0.0 }
 0x202   :  { %v253_v43 = vrot.slane %v252_v42, 4 }
 0x204   :  { %v254_v44 = vadd.f32 %v253_v43, %v252_v42 }
 0x206   :  { %v255_v45 = vrot.slane %v254_v44, 2 }
 0x208   :  { %v256_v46 = vadd.f32 %v255_v45, %v254_v44 }
 0x20a   :  { %v257_v47 = vrot.slane %v256_v46, 1 }
 0x20c   :  { %v258_v48 = vadd.f32 %v257_v47, %v256_v46 }
 0x20e   :  { %328 = vrcp.f32 %v258_v48 }
 0x218   :  { %v329_v49 = vpop.eup %328 }
 0x219   :  { %v260_v50 = vmul.f32 %v329_v49, %v327_v41 }
 0x21b   :  { %261 = vst.msk [vmem:[#allocation7] sm:$0x1f] %vm241_vm4, %v260_v50 }
 0x21c   :  { %385 = shalt.err (!%p382_p6)
}
 0x21d   :  { %s386_s10 = scalar_lea.hbm %s482_s2, 128 }
 0x21e   :  { %p387_p7 = scmp.ne.s32.totalorder %s482_s2, %s386_s10  ;;  %p390_p8 = scmp.lt.u32.totalorder %s386_s10, %s482_s2 }
 0x220   :  { %p392_p9 = pnand %p390_p8, %p387_p7 }
 0x222   :  { %395 = shalt.err (!%p392_p9)
}
 0x223   :  { %271 = dma.vmem_to_hbm [thread:$0]  %s269_s6, 128, %s482_s2, [#allocation4]  }
 0x224   :  { %400 = dma.done.wait [#allocation4], 128  }
 0x225   :  { %401 = vsyncadd [#allocation4], 4294967168 }
 0x226   :  { %275 = vsyncpa [#allocation3], 1 }
 0x227   :  { %276 = vsyncpa [#allocation6], 1 }
 0x228   :  { %277 = vsyncpa [#allocation4], 1 }

</bundles_post_ra>
